<compile_context>
chip_gen: v5e
topology: v5e:2x2
jax: 0.10.0
libtpu: 0.0.40
codegen_flags: <defaults>
</compile_context>

<pallas_src>
import functools

import jax
import jax.numpy as jnp
from jax.experimental import pallas as pl
from jax.experimental.pallas import tpu as pltpu


LANE = 128
_ELEM_BUDGET = 512 * 1024   # elements of x per streamed (C, thw) tile (~2 MiB f32)
_MAX_THW = 32 * 1024        # upper bound on lanes per spatial tile


def _pick_thw(C: int, HW: int) -> int:
    """Spatial tile (lanes): multiple of 128 and <= HW, or HW itself if HW < 128."""
    if HW <= LANE:
        return HW
    budget = max(LANE, ((_ELEM_BUDGET // max(C, 1)) // LANE) * LANE)
    full_tiles = (HW // LANE) * LANE          # largest lane-aligned tile <= HW
    return max(LANE, min(budget, _MAX_THW, full_tiles))


def _pool_gate_kernel(x_ref, wt_ref, b_ref, gate_ref, acc_ref, *,
                      inv_hw, hw, thw, mask_tail):
    # x_ref   : (1, C, thw)   one spatial tile of one batch element (native dtype)
    # wt_ref  : (C, C)        PRE-transposed 1x1-conv weight (in_ch, out_ch), f32
    # b_ref   : (1, C)        bias, f32
    # gate_ref: (1, C, 1)     sigmoid gate (output block resident across hw tiles)
    # acc_ref : (1, C) f32    running channel sums
    k = pl.program_id(1)

    @pl.when(k == 0)
    def _init():
        acc_ref[...] = jnp.zeros_like(acc_ref)

    x = x_ref[...].astype(jnp.float32)
    if mask_tail:
        # Zero the out-of-bounds lanes of the final partial tile so the mean is exact.
        lane = jax.lax.broadcasted_iota(jnp.int32, x.shape, dimension=2)
        x = jnp.where(k * thw + lane < hw, x, 0.0)
    acc_ref[...] += jnp.sum(x, axis=-1)

    @pl.when(k == pl.num_programs(1) - 1)
    def _finish():
        pooled = acc_ref[...] * inv_hw                                   # (1, C)
        y = jnp.dot(pooled, wt_ref[...],
                    preferred_element_type=jnp.float32) + b_ref[...]     # (1, C)
        gate_ref[...] = jax.nn.sigmoid(y)[:, :, None].astype(gate_ref.dtype)


def _apply_gate_kernel(x_ref, gate_ref, o_ref):
    # x_ref: (1, C, thw); gate_ref: (1, C, 1) broadcasts over the lane axis.
    o_ref[...] = (x_ref[...] * gate_ref[...]).astype(o_ref.dtype)


@jax.jit
def channel_attention(x, weight, bias):
    """x: (B, C, H, W); weight: (C, C, 1, 1); bias: (C,)."""
    B, C, H, W = x.shape
    HW = H * W
    thw = _pick_thw(C, HW)
    n_hw = pl.cdiv(HW, thw)

    x3 = x.reshape(B, C, HW)                                   # free reshape, no copy
    wt = weight.reshape(C, C).T.astype(jnp.float32)            # (in_ch, out_ch), tiny
    b2d = bias.astype(jnp.float32).reshape(1, C)

    esz = jnp.dtype(x3.dtype).itemsize
    vmem_limit = int(min(64 << 20,
                         max(32 << 20,
                             4 * C * thw * esz + 2 * C * C * 4 + (4 << 20))))

    # ---- Pass 1: global-avg-pool + 1x1 conv + sigmoid -> gate (B, C, 1) ----
    gate = pl.pallas_call(
        functools.partial(_pool_gate_kernel, inv_hw=float(1.0 / HW), hw=HW,
                          thw=thw, mask_tail=(HW % thw != 0)),
        out_shape=jax.ShapeDtypeStruct((B, C, 1), jnp.float32),
        grid_spec=pltpu.PrefetchScalarGridSpec(
            num_scalar_prefetch=0,
            grid=(B, n_hw),                                    # reduction axis last
            in_specs=[
                pl.BlockSpec((1, C, thw), lambda b, k: (b, 0, k)),
                pl.BlockSpec((C, C), lambda b, k: (0, 0)),     # resident weight
                pl.BlockSpec((1, C), lambda b, k: (0, 0)),     # resident bias
            ],
            out_specs=pl.BlockSpec((1, C, 1), lambda b, k: (b, 0, 0)),
            scratch_shapes=[pltpu.VMEM((1, C), jnp.float32)],
        ),
        compiler_params=pltpu.CompilerParams(
            dimension_semantics=("parallel", "arbitrary"),
            vmem_limit_bytes=vmem_limit),
    )(x3, wt, b2d)

    # ---- Pass 2: out = x * gate, fully parallel over (B, hw tiles) ----------
    out = pl.pallas_call(
        _apply_gate_kernel,
        out_shape=jax.ShapeDtypeStruct((B, C, HW), x3.dtype),
        grid_spec=pltpu.PrefetchScalarGridSpec(
            num_scalar_prefetch=0,
            grid=(B, n_hw),
            in_specs=[
                pl.BlockSpec((1, C, thw), lambda b, k: (b, 0, k)),
                pl.BlockSpec((1, C, 1), lambda b, k: (b, 0, 0)),
            ],
            out_specs=pl.BlockSpec((1, C, thw), lambda b, k: (b, 0, k)),
        ),
        compiler_params=pltpu.CompilerParams(
            dimension_semantics=("parallel", "parallel"),
            vmem_limit_bytes=vmem_limit),
    )(x3, gate)

    return out.reshape(B, C, H, W)


def channel_attention_ref(x, weight, bias):
    # Pure-JAX reference mirroring the PyTorch forward.
    pooled = jnp.mean(x.astype(jnp.float32), axis=(2, 3))      # (B, C)
    w2d = weight.reshape(weight.shape[0], weight.shape[1]).astype(jnp.float32)
    y = pooled @ w2d.T + bias.astype(jnp.float32)[None, :]     # (B, C)
    gate = jax.nn.sigmoid(y)[:, :, None, None]                 # (B, C, 1, 1)
    return (x * gate).astype(x.dtype)


if __name__ == "__main__":
    key = jax.random.PRNGKey(0)
    ks = jax.random.split(key, 9)

    # Case 1: lane-aligned spatial (HW = 256).
    B, C, H, W = 2, 4, 16, 16
    x = jax.random.normal(ks[0], (B, C, H, W), dtype=jnp.float32)
    weight = jax.random.normal(ks[1], (C, C, 1, 1), dtype=jnp.float32) * 0.1
    bias = jax.random.normal(ks[2], (C,), dtype=jnp.float32) * 0.1
    out = jax.block_until_ready(channel_attention(x, weight, bias))
    ref = channel_attention_ref(x, weight, bias)
    assert out.shape == (B, C, H, W)
    assert jnp.allclose(out, ref, atol=1e-5, rtol=1e-5), "mismatch (case 1)"

    # Case 2: small unaligned shapes (C=12, HW=49 < 128 -> single full-width tile).
    B2, C2, H2, W2 = 2, 12, 7, 7
    x2 = jax.random.normal(ks[3], (B2, C2, H2, W2), dtype=jnp.float32)
    w2 = jax.random.normal(ks[4], (C2, C2, 1, 1), dtype=jnp.float32) * 0.1
    b2 = jax.random.normal(ks[5], (C2,), dtype=jnp.float32) * 0.1
    out2 = jax.block_until_ready(channel_attention(x2, w2, b2))
    ref2 = channel_attention_ref(x2, w2, b2)
    assert out2.shape == (B2, C2, H2, W2)
    assert jnp.allclose(out2, ref2, atol=1e-5, rtol=1e-5), "mismatch (case 2)"

    # Case 3: exercises the partial-tile mask path (HW=169 -> tiles 128 + 41).
    B3, C3, H3, W3 = 1, 6, 13, 13
    x3 = jax.random.normal(ks[6], (B3, C3, H3, W3), dtype=jnp.float32)
    w3 = jax.random.normal(ks[7], (C3, C3, 1, 1), dtype=jnp.float32) * 0.1
    b3 = jax.random.normal(ks[8], (C3,), dtype=jnp.float32) * 0.1
    out3 = jax.block_until_ready(channel_attention(x3, w3, b3))
    ref3 = channel_attention_ref(x3, w3, b3)
    assert out3.shape == (B3, C3, H3, W3)
    assert jnp.allclose(out3, ref3, atol=1e-5, rtol=1e-5), "mismatch (case 3)"

    print("KERNEL_OK")
</pallas_src>

<mosaic_0001>
module attributes {stable_mosaic.version = 11 : i64} {
  func.func @_apply_gate_kernel(%arg0: i32, %arg1: i32, %arg2: memref<1x4x256xf32, #tpu.memory_space<vmem>>, %arg3: memref<1x4x1xf32, #tpu.memory_space<vmem>>, %arg4: memref<1x4x256xf32, #tpu.memory_space<vmem>>) attributes {dimension_semantics = [#tpu.dimension_semantics<parallel>, #tpu.dimension_semantics<parallel>], iteration_bounds = array<i64: 2, 1>, scalar_prefetch = 0 : i64, scratch_operands = 0 : i64, tpu.core_type = #tpu.core_type<tc>, window_params = [{transform_indices = @transform_0, window_bounds = array<i64: 1, 4, 256>}, {transform_indices = @transform_1, window_bounds = array<i64: 1, 4, 1>}, {transform_indices = @transform_2, window_bounds = array<i64: 1, 4, 256>}]} {
    %c0 = arith.constant 0 : index
    %c0_0 = arith.constant 0 : index
    %c0_1 = arith.constant 0 : index
    %0 = vector.load %arg2[%c0, %c0_0, %c0_1] : memref<1x4x256xf32, #tpu.memory_space<vmem>>, vector<1x4x256xf32>
    %c0_2 = arith.constant 0 : index
    %c0_3 = arith.constant 0 : index
    %c0_4 = arith.constant 0 : index
    %1 = vector.load %arg3[%c0_2, %c0_3, %c0_4] : memref<1x4x1xf32, #tpu.memory_space<vmem>>, vector<1x4x1xf32>
    %2 = vector.broadcast %1 : vector<1x4x1xf32> to vector<1x4x256xf32>
    %3 = arith.mulf %0, %2 : vector<1x4x256xf32>
    %c0_5 = arith.constant 0 : index
    %c0_6 = arith.constant 0 : index
    %c0_7 = arith.constant 0 : index
    %4 = vector.load %arg4[%c0_5, %c0_6, %c0_7] : memref<1x4x256xf32, #tpu.memory_space<vmem>>, vector<1x4x256xf32>
    tpu.vector_store %arg4[%c0_5, %c0_6, %c0_7], %3 {strides = array<i32>} : memref<1x4x256xf32, #tpu.memory_space<vmem>>, vector<1x4x256xf32>,
    return
  }
  func.func @transform_0(%arg0: i32, %arg1: i32) -> (i32, i32, i32) {
    %c0_i32 = arith.constant 0 : i32
    %c0_i32_0 = arith.constant 0 : i32
    return %arg0, %c0_i32, %arg1 : i32, i32, i32
  }
  func.func @transform_1(%arg0: i32, %arg1: i32) -> (i32, i32, i32) {
    %c0_i32 = arith.constant 0 : i32
    %c0_i32_0 = arith.constant 0 : i32
    %c0_i32_1 = arith.constant 0 : i32
    return %arg0, %c0_i32, %c0_i32_0 : i32, i32, i32
  }
  func.func @transform_2(%arg0: i32, %arg1: i32) -> (i32, i32, i32) {
    %c0_i32 = arith.constant 0 : i32
    %c0_i32_0 = arith.constant 0 : i32
    return %arg0, %c0_i32, %arg1 : i32, i32, i32
  }
}

module attributes {stable_mosaic.version = 11 : i64} {
  func.func @_pool_gate_kernel(%arg0: i32, %arg1: i32, %arg2: memref<1x4x256xf32, #tpu.memory_space<vmem>>, %arg3: memref<4x4xf32, #tpu.memory_space<vmem>>, %arg4: memref<1x4xf32, #tpu.memory_space<vmem>>, %arg5: memref<1x4x1xf32, #tpu.memory_space<vmem>>, %arg6: memref<1x4xf32, #tpu.memory_space<vmem>>) attributes {dimension_semantics = [#tpu.dimension_semantics<parallel>, #tpu.dimension_semantics<arbitrary>], iteration_bounds = array<i64: 2, 1>, scalar_prefetch = 0 : i64, scratch_operands = 1 : i64, tpu.core_type = #tpu.core_type<tc>, window_params = [{transform_indices = @transform_0, window_bounds = array<i64: 1, 4, 256>}, {pipeline_mode = #tpu.pipeline_mode<synchronous>, transform_indices = @transform_1, window_bounds = array<i64: 4, 4>}, {pipeline_mode = #tpu.pipeline_mode<synchronous>, transform_indices = @transform_2, window_bounds = array<i64: 1, 4>}, {transform_indices = @transform_3, window_bounds = array<i64: 1, 4, 1>}]} {
    %c0_i32 = arith.constant 0 : i32
    %0 = arith.cmpi eq, %arg1, %c0_i32 : i32
    %1 = arith.extui %0 : i1 to i32
    %c0_i32_0 = arith.constant 0 : i32
    %2 = arith.cmpi ne, %1, %c0_i32_0 : i32
    scf.if %2 {
      %cst_9 = arith.constant 0.000000e+00 : f32
      %11 = vector.broadcast %cst_9 : f32 to vector<1x4xf32>
      %c0_10 = arith.constant 0 : index
      %c0_11 = arith.constant 0 : index
      %12 = vector.load %arg6[%c0_10, %c0_11] : memref<1x4xf32, #tpu.memory_space<vmem>>, vector<1x4xf32>
      tpu.vector_store %arg6[%c0_10, %c0_11], %11 {strides = array<i32>} : memref<1x4xf32, #tpu.memory_space<vmem>>, vector<1x4xf32>,
    } else {
    }
    %c0 = arith.constant 0 : index
    %c0_1 = arith.constant 0 : index
    %c0_2 = arith.constant 0 : index
    %3 = vector.load %arg2[%c0, %c0_1, %c0_2] : memref<1x4x256xf32, #tpu.memory_space<vmem>>, vector<1x4x256xf32>
    %c0_3 = arith.constant 0 : index
    %c0_4 = arith.constant 0 : index
    %4 = vector.load %arg6[%c0_3, %c0_4] : memref<1x4xf32, #tpu.memory_space<vmem>>, vector<1x4xf32>
    %cst = arith.constant dense<0.000000e+00> : vector<1x4xf32>
    %5 = vector.multi_reduction <add>, %3, %cst [2] : vector<1x4x256xf32> to vector<1x4xf32>
    %6 = arith.addf %4, %5 : vector<1x4xf32>
    %c0_5 = arith.constant 0 : index
    %c0_6 = arith.constant 0 : index
    %7 = vector.load %arg6[%c0_5, %c0_6] : memref<1x4xf32, #tpu.memory_space<vmem>>, vector<1x4xf32>
    tpu.vector_store %arg6[%c0_5, %c0_6], %6 {strides = array<i32>} : memref<1x4xf32, #tpu.memory_space<vmem>>, vector<1x4xf32>,
    %c0_i32_7 = arith.constant 0 : i32
    %8 = arith.cmpi eq, %arg1, %c0_i32_7 : i32
    %9 = arith.extui %8 : i1 to i32
    %c0_i32_8 = arith.constant 0 : i32
    %10 = arith.cmpi ne, %9, %c0_i32_8 : i32
    scf.if %10 {
      %c0_9 = arith.constant 0 : index
      %c0_10 = arith.constant 0 : index
      %11 = vector.load %arg6[%c0_9, %c0_10] : memref<1x4xf32, #tpu.memory_space<vmem>>, vector<1x4xf32>
      %cst_11 = arith.constant 3.906250e-03 : f32
      %12 = vector.broadcast %cst_11 : f32 to vector<1x4xf32>
      %13 = arith.mulf %11, %12 : vector<1x4xf32>
      %c0_12 = arith.constant 0 : index
      %c0_13 = arith.constant 0 : index
      %14 = vector.load %arg3[%c0_12, %c0_13] : memref<4x4xf32, #tpu.memory_space<vmem>>, vector<4x4xf32>
      %cst_14 = arith.constant dense<0.000000e+00> : vector<1x4xf32>
      %15 = tpu.matmul %13, %14, %cst_14 {dimension_numbers = #tpu.dot_dimension_numbers<[1], [0], [0], [1], [0, 0, 1, 1], [], []>} : vector<1x4xf32>, vector<4x4xf32>, vector<1x4xf32> -> vector<1x4xf32>
      %c0_15 = arith.constant 0 : index
      %c0_16 = arith.constant 0 : index
      %16 = vector.load %arg4[%c0_15, %c0_16] : memref<1x4xf32, #tpu.memory_space<vmem>>, vector<1x4xf32>
      %17 = arith.addf %15, %16 : vector<1x4xf32>
      %18 = arith.negf %17 : vector<1x4xf32>
      %19 = math.exp %18 : vector<1x4xf32>
      %cst_17 = arith.constant 1.000000e+00 : f32
      %20 = vector.broadcast %cst_17 : f32 to vector<1x4xf32>
      %21 = arith.addf %20, %19 : vector<1x4xf32>
      %22 = arith.divf %20, %21 : vector<1x4xf32>
      %23 = vector.shape_cast %22 : vector<1x4xf32> to vector<1x4x1xf32>
      %c0_18 = arith.constant 0 : index
      %c0_19 = arith.constant 0 : index
      %c0_20 = arith.constant 0 : index
      %24 = vector.load %arg5[%c0_18, %c0_19, %c0_20] : memref<1x4x1xf32, #tpu.memory_space<vmem>>, vector<1x4x1xf32>
      tpu.vector_store %arg5[%c0_18, %c0_19, %c0_20], %23 {strides = array<i32>} : memref<1x4x1xf32, #tpu.memory_space<vmem>>, vector<1x4x1xf32>,
    } else {
    }
    return
  }
  func.func @transform_0(%arg0: i32, %arg1: i32) -> (i32, i32, i32) {
    %c0_i32 = arith.constant 0 : i32
    %c0_i32_0 = arith.constant 0 : i32
    return %arg0, %c0_i32, %arg1 : i32, i32, i32
  }
  func.func @transform_1(%arg0: i32, %arg1: i32) -> (i32, i32) {
    %c0_i32 = arith.constant 0 : i32
    %c0_i32_0 = arith.constant 0 : i32
    %c0_i32_1 = arith.constant 0 : i32
    return %c0_i32, %c0_i32_0 : i32, i32
  }
  func.func @transform_2(%arg0: i32, %arg1: i32) -> (i32, i32) {
    %c0_i32 = arith.constant 0 : i32
    %c0_i32_0 = arith.constant 0 : i32
    %c0_i32_1 = arith.constant 0 : i32
    return %c0_i32, %c0_i32_0 : i32, i32
  }
  func.func @transform_3(%arg0: i32, %arg1: i32) -> (i32, i32, i32) {
    %c0_i32 = arith.constant 0 : i32
    %c0_i32_0 = arith.constant 0 : i32
    %c0_i32_1 = arith.constant 0 : i32
    return %arg0, %c0_i32, %c0_i32_0 : i32, i32, i32
  }
}

</mosaic_0001>

<bundles_post_ra>
// kernel: channel_attention.3
= control target key start
LH: loop header
LB: loop body
LE: loop exit
PB: predicated region body
PF: predicated region fallthrough
CT: control target
= control target key end

     0   :  { %s394_s9 = smov 0   ;;  %s396_s10 = smov 0   ;;  %s427_s0 = inlined_call_operand.vmem [shape: f32[2,4,256], index: 0, kind: input, shape index: {}]   ;;  %s428_s1 = inlined_call_operand.vmem [shape: f32[2,4,1], index: 1, kind: input, shape index: {}]   ;;  %s429_s2 = inlined_call_operand.vmem [shape: f32[2,4,256], index: 2, kind: output, shape index: {}]  }
   0x1   :  { %s398_s11 = smov 0  }
   0x2 LB: > { %s24_s12 = sadd.s32 1, %s371_s10  ;;  %p316_p0 = scmp.ge.s32.totalorder %s375_s11, 1  ;;  %s375_s11 = sphi %s398_s11, %s12_s11   ;;  %s371_s10 = sphi %s396_s10, %s431_s10   ;;  %s367_s9 = sphi %s394_s9, %s430_s9  }
   0x3   : > { %p26_p1 = scmp.ge.s32.totalorder %s24_s12, 2  ;;  %p142_p2 = scmp.lt.s32.totalorder %s375_s11, 3 }
   0x5   : > { %s433_s12 = smov (%p26_p1, %s24_s12), 0  ;;  %p143_p3 = pnand %p316_p0, %p142_p2 }
   0x6   : > { %p177_p4 = scmp.lt.s32.totalorder (!%p143_p3), %s367_s9, 1 }
   0x7   : > { %146 = sbr.rel (%p143_p3) target bundleno = 136 (0x88), region = 28 }
   0xc   : > { %v377_v0 = vmov 0   ;;  %s435_s9 = smov (!%p177_p4, %s367_s9), 1  ;;  %v378_v2 = vmov 839922192  }
   0xd   : > { %352 = vset.pattern.permute.xlu0 %v377_v0  ;;  %s319_s13 = sshll.u32 %s435_s9, 2  ;;  %v207_v3 = vunpack.c.l.s4 %v378_v2  ;;  %s324_s17 = sshll.u32 %s435_s9, 3 }
   0xe   : > { %s189_s16 = scalar_lea.vmem %s428_s1, %s319_s13  ;;  %s184_s20 = scalar_lea.vmem %s427_s0, %s324_s17 }
   0xf   : > { %v201_v1 = vld [vmem:[%s189_s16] sm:$0xf]  ;;  %v208_v4 = vunpack.c.0.s8 %v207_v3  ;;  %s198_s23 = scalar_lea.vmem %s429_s2, %s324_s17 }
  0x10   : > { %204 = vperm.xlu0 %352, %v201_v1   ;;  %v200_v6 = vld [vmem:[%s184_s20] sm:$0xff] }
  0x82   : > { %v205_v5 = vpop.permute.xlu0 %204 }
  0x83   : > { %v209_v7 = vperm.slane %v205_v5, %v208_v4 }
  0x85   : > { %v211_v8 = vmul.f32 %v209_v7, %v200_v6 }
  0x87   : > { %212 = vst [vmem:[%s198_s23] sm:$0xff] %v211_v8 }
  0x88 PF: > { %s12_s11 = sadd.s32 1, %s375_s11   ;;  %s430_s9 = smov %s371_s10 }
  0x89   : > { %p9_p5 = scmp.ge.s32.totalorder %s12_s11, 4   ;;  %s431_s10 = smov %s433_s12 }
  0x8b   :  { %11 = sbr.rel (!%p9_p5) target bundleno = 2 (0x2), region = 61 }

// kernel: channel_attention.2
= control target key start
LH: loop header
LB: loop body
LE: loop exit
PB: predicated region body
PF: predicated region fallthrough
CT: control target
= control target key end

     0   :  { %s462_s12 = smov 0   ;;  %s464_s13 = smov 0   ;;  %s510_s0 = inlined_call_operand.vmem [shape: f32[2,4,256], index: 0, kind: input, shape index: {}]   ;;  %s511_s1 = inlined_call_operand.vmem [shape: f32[4,4], index: 1, kind: input, shape index: {}]   ;;  %s512_s2 = inlined_call_operand.vmem [shape: f32[1,4], index: 2, kind: input, shape index: {}]   ;;  %s513_s3 = inlined_call_operand.vmem [shape: f32[2,4,1], index: 3, kind: output, shape index: {}]  }
   0x1   :  { %s466_s14 = smov 0  }
   0x2 LB: > { %s25_s15 = sadd.s32 1, %s434_s13  ;;  %p373_p0 = scmp.ge.s32.totalorder %s438_s14, 1  ;;  %s438_s14 = sphi %s466_s14, %s13_s14   ;;  %s434_s13 = sphi %s464_s13, %s515_s13   ;;  %s430_s12 = sphi %s462_s12, %s514_s12  }
   0x3   : > { %p27_p1 = scmp.ge.s32.totalorder %s25_s15, 2  ;;  %p156_p2 = scmp.lt.s32.totalorder %s438_s14, 3 }
   0x5   : > { %s517_s15 = smov (%p27_p1, %s25_s15), 0  ;;  %p157_p3 = pnand %p373_p0, %p156_p2 }
   0x6   : > { %p184_p4 = scmp.lt.s32.totalorder (!%p157_p3), %s430_s12, 1 }
   0x7   : > { %160 = sbr.rel (%p157_p3) target bundleno = 559 (0x22f), region = 32 }
   0xc   : > { %s519_s12 = smov (!%p184_p4, %s430_s12), 1  ;;  %vm211_vm0 = vcmask 1043456   ;;  %v440_v6 = vmov 0   ;;  %vm201_vm1 = vcmask 24576   ;;  %v441_v7 = vmov 0.0  }
   0xd   : > { %s382_s16 = sshll.u32 %s519_s12, 3  ;;  %409 = vset.pattern.permute.xlu0 %v440_v6  ;;  %202 = vst.msk [vmem:[#allocation2] sm:$0x1] %vm201_vm1, %v441_v7  ;;  %v245_v14 = vld [vmem:[%s511_s1] sm:$0xf]  ;;  %v233_v15 = vlaneseq  ;;  %vm247_vm2 = vcmask 31744  }
   0xe   : > { %s191_s19 = scalar_lea.vmem %s510_s0, %s382_s16  ;;  %377 = vmatpush.msk.msra.mxu0 %vm211_vm0, %v245_v14  ;;  %v246_v24 = vld [vmem:[%s512_s2] sm:$0x1]  ;;  %s376_s24 = sshll.u32 %s519_s12, 2  ;;  %vm300_vm7 = vcmask 3072  }
   0xf   : > { %v203_v0 = vld [vmem:[%s191_s19] sm:$0xff]  ;;  %v234_v16 = vand.u32 127, %v233_v15  ;;  %v295_v23 = vshrl.u32 %v233_v15, 7  ;;  %s196_s27 = scalar_lea.vmem %s513_s3, %s376_s24 }
  0x10   : > { %206 = vst [vmem:[#allocation1] ss:$2 sm:$0xff] %v203_v0 }
  0x11   : > { %410 = vset.pattern.permute.xlu1 %v295_v23 }
  0x14   : > { %v204_v17 = vld [vmem:[#allocation2] sm:$0x1] }
  0x17   : > { %v207_v1 = vld.sshfl [vmem:[#allocation1] sm:$0xff pattern:$0x75316420]  ;;  %v208_v2 = vld.sshfl [vmem:[#allocation1 + $0x8] sm:$0xff pattern:$0x75316420] }
  0x18   : > { %v212_v3 = vsel %vm211_vm0, %v207_v1, 0.0  ;;  %v213_v4 = vsel %vm211_vm0, %v208_v2, 0.0 }
  0x19   : > { %v214_v5 = vadd.f32 %v213_v4, %v212_v3 }
  0x1b   : > { %215 = vadd.xlane.f32.xlu0 %v214_v5 }
  0x8e   : > { %v216_v8 = vpop.xlane.xlu0 %215 }
  0x8f   : > { %v218_v9 = vperm.slane %v216_v8, 0  ;;  %v219_v10 = vperm.slane %v216_v8, 1  ;;  %v220_v11 = vperm.slane %v216_v8, 2  ;;  %v221_v12 = vperm.slane %v216_v8, 3 }
  0x91   : > { %222 = vst [vmem:[#allocation1] ss:$9 sm:$0xff] %v218_v9 }
  0x92   : > { %224 = vst [vmem:[#allocation1 + $0x1] ss:$9 sm:$0xff] %v219_v10 }
  0x93   : > { %226 = vst [vmem:[#allocation1 + $0x2] ss:$9 sm:$0xff] %v220_v11 }
  0x94   : > { %228 = vst [vmem:[#allocation1 + $0x3] ss:$9 sm:$0xff] %v221_v12 }
  0x9b   : > { %v229_v13 = vld [vmem:[#allocation1] sm:$0xff] }
  0x9c   : > { %231 = vperm.xlu0 %409, %v229_v13  }
  0xa4   : > { %411 = vset.pattern.permute.xlu0 %v295_v23 }
 0x10e   : > { %v232_v18 = vpop.permute.xlu0 %231 }
 0x10f   : > { %v235_v19 = vperm.slane %v232_v18, %v234_v16 }
 0x111   : > { %v237_v20 = vadd.f32 %v235_v19, %v204_v17 }
 0x113   : > { %239 = vst.msk [vmem:[#allocation2] sm:$0x1] %vm201_vm1, %v237_v20 }
 0x11a   : > { %v243_v21 = vld [vmem:[#allocation2] sm:$0x1] }
 0x11b   : > { %v244_v22 = vmul.f32 0.00390625, %v243_v21 }
 0x11d   : > { %378 = vmatmul.msk.f32.vlgmr.msra.gmra.mxu0 %vm247_vm2, %v244_v22 }
 0x19a   : > { %v271_v25 = vpop.f32.mrf.mxu0 }
 0x19b   : > { %v272_v26 = vadd.f32 %v271_v25, %v246_v24 }
 0x19d   : > { %v379_v27 = vmul.f32 -1.442695, %v272_v26 }
 0x19f   : > { %412 = vpow2.f32 %v379_v27 }
 0x1a5   : > { %v413_v28 = vpop.eup %412 }
 0x1a6   : > { %v277_v29 = vadd.f32 1.0, %v413_v28 }
 0x1a8   : > { %414 = vrcp.f32 %v277_v29  ;;  %v289_v33 = vand.u32 2147483648, %v277_v29  ;;  %v287_v35 = vand.u32 2147483647, %v277_v29  ;;  %vm283_vm4 = vweird.f32 %v277_v29 }
 0x1aa   : > { %v290_v37 = vor.u32 1.1754944e-38, %v289_v33  ;;  %vm288_vm6 = vcmp.eq.f32.partialorder %v287_v35, 8.507059e+37 }
 0x1ae   : > { %v415_v30 = vpop.eup %414 }
 0x1af   : > { %v279_v31 = vmul.f32 %v415_v30, %v277_v29  ;;  %vm284_vm3 = vweird.f32 %v415_v30 }
 0x1b0   : > { %vm285_vm5 = vmor %vm283_vm4, %vm284_vm3 }
 0x1b1   : > { %v280_v32 = vsub.f32 1.0, %v279_v31 }
 0x1b3   : > { %v281_v34 = vmul.f32 %v415_v30, %v280_v32 }
 0x1b5   : > { %v282_v36 = vadd.f32 %v415_v30, %v281_v34 }
 0x1b7   : > { %v286_v38 = vsel %vm285_vm5, %v415_v30, %v282_v36 }
 0x1b8   : > { %v291_v39 = vsel %vm288_vm6, %v290_v37, %v286_v38 }
 0x1b9   : > { %v293_v40 = vperm.slane %v291_v39, 0 }
 0x1bb   : > { %298 = vperm.xlu1 %410, %v293_v40  }
 0x22d   : > { %v299_v41 = vpop.permute.xlu1 %298 }
 0x22e   : > { %301 = vst.msk [vmem:[%s196_s27] sm:$0xf] %vm300_vm7, %v299_v41 }
 0x22f PF: > { %s13_s14 = sadd.s32 1, %s438_s14   ;;  %s514_s12 = smov %s434_s13 }
 0x230   : > { %p10_p5 = scmp.ge.s32.totalorder %s13_s14, 4   ;;  %s515_s13 = smov %s517_s15 }
 0x232   :  { %12 = sbr.rel (!%p10_p5) target bundleno = 2 (0x2), region = 73 }

</bundles_post_ra>
